<compile_context>
chip_gen: v6e
topology: v6e:2x2x1
jax: 0.10.0
libtpu: 0.0.40
codegen_flags: <defaults>
</compile_context>

<pallas_src>
import jax
import jax.numpy as jnp
from jax import lax
from jax.experimental import pallas as pl
from jax.experimental.pallas import tpu as pltpu


_LANES = 128


def _round_up(x, m):
    return ((x + m - 1) // m) * m


def _make_attention_kernel(ts, n_s_tiles, s_len, s_pad):
    """ts: source rows per tile; n_s_tiles: grid extent along S; s_len: true S; s_pad: padded S."""

    def kernel(h_ref, enc_ref, w_ref, v_ref, out_ref, acc_ref):
        # h_ref   : (TB, HP)       hidden @ W_h^T + b, lane-padded to HP
        # enc_ref : (TS, TB, 2H)   encoder_outputs tile (native (S, B, 2H) layout)
        # w_ref   : (2H, HP)       W_e^T, lane-padded
        # v_ref   : (1, HP)        scoring vector, lane-padded
        # out_ref : (TB, S_pad)    softmax attention weights (VMEM-resident across the S axis)
        # acc_ref : (S_pad, TB)    VMEM scratch holding raw scores for the current batch block
        sj = pl.program_id(1)

        enc = enc_ref[...].astype(jnp.float32)            # f32 compute path (input may be bf16)
        tb = enc.shape[1]
        k = enc.shape[2]
        hp = w_ref.shape[1]

        # One tall-skinny MXU matmul over the flattened (s, b) rows: (TS*TB, 2H) @ (2H, HP).
        proj = jnp.dot(
            enc.reshape(ts * tb, k),
            w_ref[...].astype(jnp.float32),
            preferred_element_type=jnp.float32,
            precision=lax.Precision.HIGHEST,
        )

        # energy = tanh(enc @ W_e^T + (hidden @ W_h^T + b))   (split Linear; no concat)
        energy = jnp.tanh(proj.reshape(ts, tb, hp) + h_ref[...][None, :, :])

        # scores[s, b] = sum_h v[h] * energy[s, b, h]  (VPU multiply + lane reduce, not MXU matvec)
        scores = jnp.sum(energy * v_ref[...][None, :, :], axis=-1)        # (TS, TB)

        if n_s_tiles == 1:
            acc_ref[...] = scores
        else:
            start = pl.multiple_of(sj * ts, ts)
            acc_ref[pl.ds(start, ts), :] = scores

        # Last S tile of this batch block: softmax over the full source length.
        @pl.when(sj == n_s_tiles - 1)
        def _():
            x = acc_ref[...].T                                            # (TB, S_pad)
            if s_pad > s_len:                                             # mask padded positions
                col = lax.broadcasted_iota(jnp.int32, x.shape, 1)
                x = jnp.where(col < s_len, x, -jnp.inf)
            m = jnp.max(x, axis=-1, keepdims=True)
            p = jnp.exp(x - m)
            out_ref[...] = p / jnp.sum(p, axis=-1, keepdims=True)         # single lane-dense store

    return kernel


def prepare_attention_params(w_attn, b_attn, v):
    """One-time parameter prep (hoisted out of the per-call path).

    w_attn: (H, 3H) Linear weight, b_attn: (H,), v: (H,).
    Splits the Linear into its `hidden` half (H, H) and `encoder` half, transposes the
    encoder half for the in-kernel matmul and zero-pads the H axis up to 128 lanes
    (padded columns contribute exactly 0 to the scores).
    """
    H = w_attn.shape[0]
    HP = _round_up(max(H, _LANES), _LANES)
    w_h = w_attn[:, :H].astype(jnp.float32)                                    # (H, H)
    w_e_t = jnp.zeros((2 * H, HP), jnp.float32).at[:, :H].set(
        w_attn[:, H:].astype(jnp.float32).T)                                   # (2H, HP)
    b = b_attn.astype(jnp.float32)                                             # (H,)
    v_p = jnp.zeros((1, HP), jnp.float32).at[0, :H].set(v.astype(jnp.float32))  # (1, HP)
    return w_h, w_e_t, b, v_p


def _choose_tiles(S, B):
    # Batch block: full batch when small, otherwise sublane-aligned 8-row blocks.
    tb = B if B <= 8 else 8
    # Source block: whole source if it comfortably fits VMEM, else 256-row chunks
    # (keeps double-buffered tiles at a few MB -> safe under v7x's smaller VMEM).
    ts = S if S <= 512 else 256
    s_pad = _round_up(S, ts)
    return tb, ts, s_pad


def attention_forward(hidden, encoder_outputs, params):
    """hidden: (B, H); encoder_outputs: (S, B, 2H) (f32 or bf16); returns softmax weights (B, S)."""
    w_h, w_e_t, b, v_p = params
    S, B, twoH = encoder_outputs.shape
    H = w_h.shape[0]
    HP = w_e_t.shape[1]
    assert twoH == 2 * H

    # `hidden` half of the split Linear (+ bias): once per batch row, lane-padded.
    h_proj = jnp.dot(hidden.astype(jnp.float32), w_h.T,
                     precision=lax.Precision.HIGHEST) + b                      # (B, H)
    h_proj_p = jnp.zeros((B, HP), jnp.float32).at[:, :H].set(h_proj)

    tb, ts, s_pad = _choose_tiles(S, B)
    n_b_tiles = pl.cdiv(B, tb)
    n_s_tiles = s_pad // ts

    out = pl.pallas_call(
        _make_attention_kernel(ts, n_s_tiles, S, s_pad),
        out_shape=jax.ShapeDtypeStruct((B, s_pad), jnp.float32),
        grid=(n_b_tiles, n_s_tiles),
        in_specs=[
            pl.BlockSpec((tb, HP), lambda bi, sj: (bi, 0)),              # hidden projection (+bias)
            pl.BlockSpec((ts, tb, 2 * H), lambda bi, sj: (sj, bi, 0)),   # encoder tile, native layout
            pl.BlockSpec((2 * H, HP), lambda bi, sj: (0, 0)),            # W_e^T (lane padded)
            pl.BlockSpec((1, HP), lambda bi, sj: (0, 0)),                # v (lane padded)
        ],
        out_specs=pl.BlockSpec((tb, s_pad), lambda bi, sj: (bi, 0)),     # resident across the S axis
        scratch_shapes=[pltpu.VMEM((s_pad, tb), jnp.float32)],
        compiler_params=pltpu.CompilerParams(
            dimension_semantics=("parallel", "arbitrary"),
            vmem_limit_bytes=32 * 1024 * 1024,
        ),
    )(h_proj_p, encoder_outputs, w_e_t, v_p)

    return out if s_pad == S else out[:, :S]


def reference_forward(hidden, encoder_outputs, w_attn, b_attn, v):
    """Plain-JAX replica of the PyTorch module (concat formulation), for checking."""
    S, B, _ = encoder_outputs.shape
    H = w_attn.shape[0]
    h_rep = jnp.broadcast_to(hidden.astype(jnp.float32)[:, None, :], (B, S, H))
    enc = jnp.transpose(encoder_outputs.astype(jnp.float32), (1, 0, 2))
    x = jnp.concatenate([h_rep, enc], axis=2)                                  # (B, S, 3H)
    energy = jnp.tanh(
        jnp.einsum("bsk,hk->bsh", x, w_attn.astype(jnp.float32),
                   precision=lax.Precision.HIGHEST)
        + b_attn.astype(jnp.float32))
    scores = jnp.sum(v.astype(jnp.float32) * energy, axis=2)
    return jax.nn.softmax(scores, axis=1)


if __name__ == "__main__":
    hidden_dim = 32
    B, S = 2, 8

    key = jax.random.PRNGKey(0)
    k1, k2, k3, k4, k5 = jax.random.split(key, 5)

    # Parameters (synthetic init matching nn.Linear(3H, H) + Parameter(H)).
    w_attn = jax.random.uniform(k1, (hidden_dim, hidden_dim * 3), jnp.float32, -0.1, 0.1)
    b_attn = jax.random.uniform(k2, (hidden_dim,), jnp.float32, -0.1, 0.1)
    v = jax.random.uniform(k3, (hidden_dim,), jnp.float32, 0.0, 1.0)

    # Inputs: hidden (B, H), encoder_outputs (S, B, 2H).
    hidden = jax.random.normal(k4, (B, hidden_dim), jnp.float32)
    encoder_outputs = jax.random.normal(k5, (S, B, 2 * hidden_dim), jnp.float32)

    params = prepare_attention_params(w_attn, b_attn, v)   # hoisted one-time prep
    fwd = jax.jit(attention_forward)

    # f32 path
    out = jax.block_until_ready(fwd(hidden, encoder_outputs, params))
    ref = reference_forward(hidden, encoder_outputs, w_attn, b_attn, v)
    assert out.shape == (B, S)
    assert jnp.allclose(jnp.sum(out, axis=1), 1.0, atol=1e-4)
    assert jnp.allclose(out, ref, atol=1e-4, rtol=1e-4), "f32 mismatch vs reference"

    # bf16 streamed activations (halves HBM traffic on the memory-bound path); math stays f32.
    enc_bf16 = encoder_outputs.astype(jnp.bfloat16)
    out_bf = jax.block_until_ready(fwd(hidden, enc_bf16, params))
    ref_bf = reference_forward(hidden, enc_bf16.astype(jnp.float32), w_attn, b_attn, v)
    assert jnp.allclose(out_bf, ref_bf, atol=1e-3, rtol=1e-3), "bf16 mismatch vs reference"

    print("KERNEL_OK")
</pallas_src>

<mosaic_0001>
module attributes {stable_mosaic.version = 11 : i64} {
  func.func @kernel(%arg0: i32, %arg1: i32, %arg2: memref<2x128xf32, #tpu.memory_space<vmem>>, %arg3: memref<8x2x64xf32, #tpu.memory_space<vmem>>, %arg4: memref<64x128xf32, #tpu.memory_space<vmem>>, %arg5: memref<1x128xf32, #tpu.memory_space<vmem>>, %arg6: memref<2x8xf32, #tpu.memory_space<vmem>>, %arg7: memref<8x2xf32, #tpu.memory_space<vmem>>) attributes {dimension_semantics = [#tpu.dimension_semantics<parallel>, #tpu.dimension_semantics<arbitrary>], iteration_bounds = array<i64: 1, 1>, scalar_prefetch = 0 : i64, scratch_operands = 1 : i64, tpu.core_type = #tpu.core_type<tc>, window_params = [{transform_indices = @transform_0, window_bounds = array<i64: 2, 128>}, {transform_indices = @transform_1, window_bounds = array<i64: 8, 2, 64>}, {pipeline_mode = #tpu.pipeline_mode<synchronous>, transform_indices = @transform_2, window_bounds = array<i64: 64, 128>}, {pipeline_mode = #tpu.pipeline_mode<synchronous>, transform_indices = @transform_3, window_bounds = array<i64: 1, 128>}, {transform_indices = @transform_4, window_bounds = array<i64: 2, 8>}]} {
    %c0 = arith.constant 0 : index
    %c0_0 = arith.constant 0 : index
    %c0_1 = arith.constant 0 : index
    %0 = vector.load %arg3[%c0, %c0_0, %c0_1] : memref<8x2x64xf32, #tpu.memory_space<vmem>>, vector<8x2x64xf32>
    %1 = vector.shape_cast %0 : vector<8x2x64xf32> to vector<16x64xf32>
    %c0_2 = arith.constant 0 : index
    %c0_3 = arith.constant 0 : index
    %2 = vector.load %arg4[%c0_2, %c0_3] : memref<64x128xf32, #tpu.memory_space<vmem>>, vector<64x128xf32>
    %cst = arith.constant dense<0.000000e+00> : vector<16x128xf32>
    %3 = tpu.matmul %1, %2, %cst {dimension_numbers = #tpu.dot_dimension_numbers<[1], [0], [0], [1], [0, 0, 1, 1], [], []>, precision = #tpu.contract_precision<fp32>} : vector<16x64xf32>, vector<64x128xf32>, vector<16x128xf32> -> vector<16x128xf32>
    %4 = vector.shape_cast %3 : vector<16x128xf32> to vector<8x2x128xf32>
    %c0_4 = arith.constant 0 : index
    %c0_5 = arith.constant 0 : index
    %5 = vector.load %arg2[%c0_4, %c0_5] : memref<2x128xf32, #tpu.memory_space<vmem>>, vector<2x128xf32>
    %6 = vector.shape_cast %5 : vector<2x128xf32> to vector<1x2x128xf32>
    %7 = vector.broadcast %6 : vector<1x2x128xf32> to vector<8x2x128xf32>
    %8 = arith.addf %4, %7 : vector<8x2x128xf32>
    %9 = math.tanh %8 : vector<8x2x128xf32>
    %c0_6 = arith.constant 0 : index
    %c0_7 = arith.constant 0 : index
    %10 = vector.load %arg5[%c0_6, %c0_7] : memref<1x128xf32, #tpu.memory_space<vmem>>, vector<1x128xf32>
    %11 = vector.shape_cast %10 : vector<1x128xf32> to vector<1x1x128xf32>
    %12 = vector.broadcast %11 : vector<1x1x128xf32> to vector<8x2x128xf32>
    %13 = arith.mulf %9, %12 : vector<8x2x128xf32>
    %cst_8 = arith.constant dense<0.000000e+00> : vector<8x2xf32>
    %14 = vector.multi_reduction <add>, %13, %cst_8 [2] : vector<8x2x128xf32> to vector<8x2xf32>
    %c0_9 = arith.constant 0 : index
    %c0_10 = arith.constant 0 : index
    %15 = vector.load %arg7[%c0_9, %c0_10] : memref<8x2xf32, #tpu.memory_space<vmem>>, vector<8x2xf32>
    tpu.vector_store %arg7[%c0_9, %c0_10], %14 {strides = array<i32>} : memref<8x2xf32, #tpu.memory_space<vmem>>, vector<8x2xf32>,
    %c0_i32 = arith.constant 0 : i32
    %16 = arith.cmpi eq, %arg1, %c0_i32 : i32
    %17 = arith.extui %16 : i1 to i32
    %c0_i32_11 = arith.constant 0 : i32
    %18 = arith.cmpi ne, %17, %c0_i32_11 : i32
    scf.if %18 {
      %c0_12 = arith.constant 0 : index
      %c0_13 = arith.constant 0 : index
      %19 = vector.load %arg7[%c0_12, %c0_13] : memref<8x2xf32, #tpu.memory_space<vmem>>, vector<8x2xf32>
      %20 = tpu.transpose %19, [1, 0] : vector<8x2xf32> -> vector<2x8xf32>
      %cst_14 = arith.constant dense<0xFF800000> : vector<2xf32>
      %21 = vector.multi_reduction <maximumf>, %20, %cst_14 [1] : vector<2x8xf32> to vector<2xf32>
      %22 = vector.shape_cast %21 : vector<2xf32> to vector<2x1xf32>
      %23 = vector.broadcast %22 : vector<2x1xf32> to vector<2x8xf32>
      %24 = arith.subf %20, %23 : vector<2x8xf32>
      %25 = math.exp %24 : vector<2x8xf32>
      %cst_15 = arith.constant dense<0.000000e+00> : vector<2xf32>
      %26 = vector.multi_reduction <add>, %25, %cst_15 [1] : vector<2x8xf32> to vector<2xf32>
      %27 = vector.shape_cast %26 : vector<2xf32> to vector<2x1xf32>
      %28 = vector.broadcast %27 : vector<2x1xf32> to vector<2x8xf32>
      %29 = arith.divf %25, %28 : vector<2x8xf32>
      %c0_16 = arith.constant 0 : index
      %c0_17 = arith.constant 0 : index
      %30 = vector.load %arg6[%c0_16, %c0_17] : memref<2x8xf32, #tpu.memory_space<vmem>>, vector<2x8xf32>
      tpu.vector_store %arg6[%c0_16, %c0_17], %29 {strides = array<i32>} : memref<2x8xf32, #tpu.memory_space<vmem>>, vector<2x8xf32>,
    } else {
    }
    return
  }
  func.func @transform_0(%arg0: i32, %arg1: i32) -> (i32, i32) {
    %c0_i32 = arith.constant 0 : i32
    %c0_i32_0 = arith.constant 0 : i32
    return %arg0, %c0_i32 : i32, i32
  }
  func.func @transform_1(%arg0: i32, %arg1: i32) -> (i32, i32, i32) {
    %c0_i32 = arith.constant 0 : i32
    %c0_i32_0 = arith.constant 0 : i32
    return %arg1, %arg0, %c0_i32 : i32, i32, i32
  }
  func.func @transform_2(%arg0: i32, %arg1: i32) -> (i32, i32) {
    %c0_i32 = arith.constant 0 : i32
    %c0_i32_0 = arith.constant 0 : i32
    %c0_i32_1 = arith.constant 0 : i32
    return %c0_i32, %c0_i32_0 : i32, i32
  }
  func.func @transform_3(%arg0: i32, %arg1: i32) -> (i32, i32) {
    %c0_i32 = arith.constant 0 : i32
    %c0_i32_0 = arith.constant 0 : i32
    %c0_i32_1 = arith.constant 0 : i32
    return %c0_i32, %c0_i32_0 : i32, i32
  }
  func.func @transform_4(%arg0: i32, %arg1: i32) -> (i32, i32) {
    %c0_i32 = arith.constant 0 : i32
    %c0_i32_0 = arith.constant 0 : i32
    return %arg0, %c0_i32 : i32, i32
  }
}

</mosaic_0001>

<bundles_post_ra>
// kernel: attention_forward.1
= control target key start
LH: loop header
LB: loop body
LE: loop exit
PB: predicated region body
PF: predicated region fallthrough
CT: control target
= control target key end

     0   :  { %9 = vsyncpa [#allocation4], 0  ;;  %s1426_s0 = inlined_call_operand.vmem [shape: f32[2,128], index: 0, kind: input, shape index: {}]   ;;  %s1427_s1 = inlined_call_operand.vmem [shape: f32[8,2,64], index: 1, kind: input, shape index: {}]   ;;  %s1428_s2 = inlined_call_operand.hbm [shape: f32[64,128], index: 2, kind: input, shape index: {}]   ;;  %s1429_s3 = inlined_call_operand.vmem [shape: f32[1,128], index: 3, kind: input, shape index: {}]   ;;  %s1430_s4 = inlined_call_operand.hbm [shape: f32[2,8], index: 4, kind: output, shape index: {}]  }
   0x1   :  { %10 = vsyncpa [#allocation5], 0  ;;  %s1145_s15 = smov [#allocation3]  }
   0x2   :  { %s20_s16 = sshll.u32 %s1145_s15, 4  ;;  %s21_s16 = int_to_ptr.vmem [resolvable:$true] %s20_s16 }
   0x3   :  { %s1109_s17 = scalar_lea.vmem %s21_s16, 1024  ;;  %p1114_p1 = scmp.lt.s32.totalorder %s21_s16, %s21_s16 }
   0x4   :  { %p1110_p0 = scmp.ne.s32.totalorder %s21_s16, %s1109_s17  ;;  %p1115_p2 = scmp.lt.s32.totalorder %s1109_s17, %s1109_s17 }
   0x6   :  { %p1116_p3 = por %p1115_p2, %p1114_p1 }
   0x8   :  { %p1117_p4 = pnand %p1116_p3, %p1110_p0 }
   0xa   :  { %1120 = shalt.err (!%p1117_p4)
}
   0xb   :  { %s1146_s18 = smov 128   ;;  %s1147_s19 = smov 8  }
   0xc   :  { %26 = dma.hbm_to_vmem [thread:$0]  %s1428_s2, 1024, %s21_s16, [#allocation4], %s1146_s18, %s1146_s18, %s1147_s19  }
   0xd   :  { %1141 = dma.done.wait [#allocation4], 1024  }
   0xe   :  { %1142 = vsyncadd [#allocation4], 4294966272  ;;  %v1148_v0 = vmov 1983009808   ;;  %v61_v2 = vlaneseq  ;;  %v47_v5 = vld [vmem:[#allocation3 + $0x38] sm:$0xff]  ;;  %v46_v6 = vld [vmem:[#allocation3 + $0x30] sm:$0xff] }
   0xf   :  { %v59_v1 = vunpack.c.l.s4 %v1148_v0  ;;  %v45_v7 = vld [vmem:[#allocation3 + $0x28] sm:$0xff]  ;;  %v1181_v8 = vand.u32 4294901760, %v47_v5  ;;  %v1183_v9 = vand.u32 4294901760, %v46_v6  ;;  %v44_v11 = vld [vmem:[#allocation3 + $0x20] sm:$0xff]  ;;  %v43_v12 = vld [vmem:[#allocation3 + $0x18] sm:$0xff]  ;;  %vm90_vm0 = vcmask 523264  }
  0x10   :  { %v1179_v4 = vshrl.u32 %v61_v2, 7  ;;  %v1185_v10 = vand.u32 4294901760, %v45_v7  ;;  %v42_v13 = vld [vmem:[#allocation3 + $0x10] sm:$0xff]  ;;  %v1187_v14 = vand.u32 4294901760, %v44_v11  ;;  %v1189_v15 = vand.u32 4294901760, %v43_v12  ;;  %v41_v17 = vld [vmem:[#allocation3 + $0x8] sm:$0xff] }
  0x11   :  { %v60_v3 = vunpack.c.0.s8 %v59_v1  ;;  %v1191_v16 = vand.u32 4294901760, %v42_v13  ;;  %v40_v18 = vld [vmem:[#allocation3] sm:$0xff]  ;;  %961 = vmatprep.subr.mxu0 %v1181_v8  ;;  %v1198_v20 = vsub.f32 %v47_v5, %v1181_v8  ;;  %v1201_v21 = vsub.f32 %v46_v6, %v1183_v9  ;;  %v32_v24 = vld [vmem:[%s1427_s1] sm:$0x3]  ;;  %v33_v25 = vld [vmem:[%s1427_s1 + $0x2] sm:$0x3] }
  0x12   :  { %v1203_v22 = vand.u32 4294901760, %v41_v17  ;;  %v1206_v23 = vsub.f32 %v45_v7, %v1185_v10  ;;  %962 = vmatpush3.msra.mxu0 %v1181_v8  ;;  %v1215_v26 = vand.u32 4294901760, %v40_v18  ;;  %v1218_v27 = vsub.f32 %v44_v11, %v1187_v14  ;;  %v34_v28 = vld [vmem:[%s1427_s1 + $0x4] sm:$0x3]  ;;  %v35_v29 = vld [vmem:[%s1427_s1 + $0x6] sm:$0x3] }
  0x13   :  { %v1194_v19 = vsub.s32 %v60_v3, %v1179_v4  ;;  %v56_v30 = vcombine.low %v32_v24, %v33_v25  ;;  %v1227_v31 = vsub.f32 %v43_v12, %v1189_v15  ;;  %963 = vmatprep.subr.mxu0 %v1183_v9  ;;  %v1231_v32 = vand.u32 4294901760, %v1198_v20  ;;  %v36_v35 = vld [vmem:[%s1427_s1 + $0x8] sm:$0x3]  ;;  %v37_v38 = vld [vmem:[%s1427_s1 + $0xa] sm:$0x3] }
  0x14   :  { %v1234_v33 = vand.u32 4294901760, %v1201_v21  ;;  %v1237_v34 = vand.u32 4294901760, %v1206_v23  ;;  %v57_v36 = vcombine.low %v34_v28, %v35_v29  ;;  %964 = vmatpush3.msra.mxu0 %v1183_v9  ;;  %v1244_v37 = vand.u32 4294901760, %v1218_v27  ;;  %v38_v39 = vld [vmem:[%s1427_s1 + $0xc] sm:$0x3] }
  0x15   :  { %v64_v40 = vrot.slane %v56_v30, %v1194_v19  ;;  %v1254_v41 = vand.u32 4294901760, %v1227_v31  ;;  %v1257_v42 = vsub.f32 %v42_v13, %v1191_v16  ;;  %965 = vmatprep.subr.mxu0 %v1185_v10  ;;  %v208_v43 = vsub.f32 %v1198_v20, %v1231_v32  ;;  %v39_v46 = vld [vmem:[%s1427_s1 + $0xe] sm:$0x3] }
  0x16   :  { %v215_v44 = vsub.f32 %v1201_v21, %v1234_v33  ;;  %v222_v45 = vsub.f32 %v1206_v23, %v1237_v34  ;;  %v71_v47 = vrot.slane %v57_v36, %v1194_v19  ;;  %966 = vmatpush3.msra.mxu0 %v1185_v10  ;;  %v73_v48 = vcombine.low %v36_v35, %v37_v38 }
  0x17   :  { %v74_v49 = vcombine.low %v38_v39, %v39_v46  ;;  %967 = vmatprep.subr.mxu0 %v1187_v14  ;;  %v209_v50 = vand.u32 4294901760, %v208_v43  ;;  %v229_v52 = vsub.f32 %v1218_v27, %v1244_v37  ;;  %v236_v57 = vsub.f32 %v1227_v31, %v1254_v41 }
  0x18   :  { %v216_v51 = vand.u32 4294901760, %v215_v44  ;;  %v72_v53 = vcombine.low %v64_v40, %v71_v47  ;;  %968 = vmatpush3.msra.mxu0 %v1187_v14  ;;  %v223_v54 = vand.u32 4294901760, %v222_v45  ;;  %v81_v55 = vrot.slane %v73_v48, %v1194_v19 }
  0x19   :  { %v88_v56 = vrot.slane %v74_v49, %v1194_v19  ;;  %969 = vmatprep.subr.mxu0 %v1189_v15  ;;  %980 = vmatprep.subr.mxu1 %v209_v50  ;;  %v1282_v59 = vand.u32 4294901760, %v1257_v42  ;;  %v1285_v60 = vsub.f32 %v41_v17, %v1203_v22  ;;  %v1288_v61 = vsub.f32 %v40_v18, %v1215_v26 }
  0x1a   :  { %v91_v58 = vsel %vm90_vm0, %v72_v53, 0  ;;  %970 = vmatpush3.msra.mxu0 %v1189_v15  ;;  %981 = vmatpush3.msra.mxu1 %v209_v50  ;;  %v230_v0 = vand.u32 4294901760, %v229_v52  ;;  %v237_v12 = vand.u32 4294901760, %v236_v57  ;;  %v719_v50 = vld [vmem:[%s1426_s0] sm:$0x3]  ;;  %vm751_vm1 = vcmask 1041408  }
  0x1b   :  { %v89_v62 = vcombine.low %v81_v55, %v88_v56  ;;  %v1291_v63 = vand.u32 4294901760, %v91_v58  ;;  %971 = vmatprep.subr.mxu0 %v1191_v16  ;;  %982 = vmatprep.subr.mxu1 %v216_v51  ;;  %v243_v1 = vsub.f32 %v1257_v42, %v1282_v59  ;;  %v1297_v3 = vand.u32 4294901760, %v1285_v60 }
  0x1c   :  { %v1300_v5 = vand.u32 4294901760, %v1288_v61  ;;  %972 = vmatpush3.msra.mxu0 %v1191_v16  ;;  %983 = vmatpush3.msra.mxu1 %v216_v51  ;;  %vm818_vm2 = vcmask 1041409   ;;  %vm820_vm3 = vcmask 1042434   ;;  %vm822_vm4 = vcmask 1043459  }
  0x1d   :  { %v93_v6 = vsel %vm90_vm0, %v89_v62, 0  ;;  %v1305_v7 = vsub.f32 %v91_v58, %v1291_v63  ;;  %973 = vmatprep.subr.mxu0 %v1203_v22  ;;  %984 = vmatprep.subr.mxu1 %v223_v54  ;;  %v250_v13 = vsub.f32 %v1285_v60, %v1297_v3  ;;  %v244_v24 = vand.u32 4294901760, %v243_v1 }
  0x1e   :  { %v1308_v11 = vand.u32 4294901760, %v93_v6  ;;  %974 = vmatpush3.msra.mxu0 %v1203_v22  ;;  %985 = vmatpush3.msra.mxu1 %v223_v54  ;;  %v257_v25 = vsub.f32 %v1288_v61, %v1300_v5  ;;  %vm824_vm5 = vcmask 1044484   ;;  %vm826_vm6 = vcmask 1045509  }
  0x1f   :  { %v170_v17 = vand.u32 4294901760, %v1305_v7  ;;  %975 = vmatprep.subr.mxu0 %v1215_v26  ;;  %986 = vmatprep.subr.mxu1 %v230_v0  ;;  %v251_v30 = vand.u32 4294901760, %v250_v13  ;;  %vm828_vm7 = vcmask 1046534   ;;  %vm830_vm8 = vcmask 1047559  }
  0x20   :  { %v1316_v18 = vsub.f32 %v93_v6, %v1308_v11  ;;  %976 = vmatpush3.msra.mxu0 %v1215_v26  ;;  %987 = vmatpush3.msra.mxu1 %v230_v0  ;;  %v258_v38 = vand.u32 4294901760, %v257_v25  ;;  %vm833_vm9 = vcmask 15360   ;;  %vm872_vm10 = vcmask 58368  }
  0x21   :  { %v171_v28 = vsub.f32 %v1305_v7, %v170_v17  ;;  %988 = vmatprep.subr.mxu1 %v237_v12  ;;  %999 = vmatprep.subr.mxu0 %v1198_v20 }
  0x22   :  { %v180_v29 = vand.u32 4294901760, %v1316_v18  ;;  %989 = vmatpush3.msra.mxu1 %v237_v12  ;;  %996 = vmatprep.mubr.f32.mxu1 %v1291_v63 }
  0x23   :  { %v172_v35 = vand.u32 4294901760, %v171_v28  ;;  %990 = vmatprep.subr.mxu1 %v244_v24 }
  0x24   :  { %v181_v36 = vsub.f32 %v1316_v18, %v180_v29  ;;  %991 = vmatpush3.msra.mxu1 %v244_v24 }
  0x25   :  { %977 = vmatprep.mubr.f32.mxu0 %v172_v35  ;;  %992 = vmatprep.subr.mxu1 %v251_v30 }
  0x26   :  { %v182_v39 = vand.u32 4294901760, %v181_v36  ;;  %993 = vmatpush3.msra.mxu1 %v251_v30 }
  0x27   :  { %994 = vmatprep.subr.mxu1 %v258_v38 }
  0x28   :  { %978 = vmatmul.mubr.f32.vlgmr.msra.gmra.mxu0 %v182_v39  ;;  %995 = vmatpush3.msra.mxu1 %v258_v38 }
  0x29   :  { %1000 = vmatpush3.msra.mxu0 %v1198_v20  ;;  %997 = vmatmul.mubr.f32.vlgmr.msra.gmra.mxu1 %v1308_v11 }
  0x2a   :  { %1001 = vmatprep.subr.mxu0 %v1201_v21  ;;  %1018 = vmatprep.subr.mxu1 %v1181_v8 }
  0x2b   :  { %1002 = vmatpush3.msra.mxu0 %v1201_v21  ;;  %1019 = vmatpush3.msra.mxu1 %v1181_v8 }
  0x2c   :  { %1003 = vmatprep.subr.mxu0 %v1206_v23  ;;  %1020 = vmatprep.subr.mxu1 %v1183_v9 }
  0x2d   :  { %1004 = vmatpush3.msra.mxu0 %v1206_v23  ;;  %1021 = vmatpush3.msra.mxu1 %v1183_v9 }
  0x2e   :  { %1005 = vmatprep.subr.mxu0 %v1218_v27  ;;  %1022 = vmatprep.subr.mxu1 %v1185_v10 }
  0x2f   :  { %1006 = vmatpush3.msra.mxu0 %v1218_v27  ;;  %1023 = vmatpush3.msra.mxu1 %v1185_v10 }
  0x30   :  { %1007 = vmatprep.subr.mxu0 %v1227_v31  ;;  %1024 = vmatprep.subr.mxu1 %v1187_v14 }
  0x31   :  { %1008 = vmatpush3.msra.mxu0 %v1227_v31  ;;  %1015 = vmatprep.mubr.f32.mxu0 %v1305_v7 }
  0x32   :  { %1009 = vmatprep.subr.mxu0 %v1257_v42  ;;  %1025 = vmatpush3.msra.mxu1 %v1187_v14 }
  0x33   :  { %1010 = vmatpush3.msra.mxu0 %v1257_v42  ;;  %1026 = vmatprep.subr.mxu1 %v1189_v15 }
  0x34   :  { %1011 = vmatprep.subr.mxu0 %v1285_v60  ;;  %1027 = vmatpush3.msra.mxu1 %v1189_v15 }
  0x35   :  { %1012 = vmatpush3.msra.mxu0 %v1285_v60  ;;  %1028 = vmatprep.subr.mxu1 %v1191_v16 }
  0x36   :  { %1013 = vmatprep.subr.mxu0 %v1288_v61  ;;  %1029 = vmatpush3.msra.mxu1 %v1191_v16 }
  0x37   :  { %1014 = vmatpush3.msra.mxu0 %v1288_v61  ;;  %1030 = vmatprep.subr.mxu1 %v1203_v22 }
  0x38   :  { %1016 = vmatmul.mubr.f32.vlgmr.msra.gmra.mxu0 %v1316_v18  ;;  %1037 = vmatprep.subr.mxu0 %v1231_v32 }
  0x39   :  { %1038 = vmatpush3.msra.mxu0 %v1231_v32  ;;  %1031 = vmatpush3.msra.mxu1 %v1203_v22 }
  0x3a   :  { %1039 = vmatprep.subr.mxu0 %v1234_v33  ;;  %1032 = vmatprep.subr.mxu1 %v1215_v26 }
  0x3b   :  { %1040 = vmatpush3.msra.mxu0 %v1234_v33  ;;  %1033 = vmatpush3.msra.mxu1 %v1215_v26 }
  0x3c   :  { %1041 = vmatprep.subr.mxu0 %v1237_v34  ;;  %1034 = vmatprep.mubr.f32.mxu1 %v170_v17 }
  0x3d   :  { %1042 = vmatpush3.msra.mxu0 %v1237_v34  ;;  %1035 = vmatmul.mubr.f32.vlgmr.msra.gmra.mxu1 %v180_v29 }
  0x3e   :  { %1043 = vmatprep.subr.mxu0 %v1244_v37  ;;  %1056 = vmatprep.subr.mxu1 %v1181_v8 }
  0x3f   :  { %1044 = vmatpush3.msra.mxu0 %v1244_v37  ;;  %1057 = vmatpush3.msra.mxu1 %v1181_v8 }
  0x40   :  { %1045 = vmatprep.subr.mxu0 %v1254_v41  ;;  %1058 = vmatprep.subr.mxu1 %v1183_v9 }
  0x41   :  { %1046 = vmatpush3.msra.mxu0 %v1254_v41  ;;  %1059 = vmatpush3.msra.mxu1 %v1183_v9 }
  0x42   :  { %1047 = vmatprep.subr.mxu0 %v1282_v59  ;;  %1060 = vmatprep.subr.mxu1 %v1185_v10 }
  0x43   :  { %1048 = vmatpush3.msra.mxu0 %v1282_v59  ;;  %1061 = vmatpush3.msra.mxu1 %v1185_v10 }
  0x44   :  { %1049 = vmatprep.subr.mxu0 %v1297_v3  ;;  %1062 = vmatprep.subr.mxu1 %v1187_v14 }
  0x45   :  { %1050 = vmatpush3.msra.mxu0 %v1297_v3  ;;  %1053 = vmatprep.mubr.f32.mxu0 %v1291_v63 }
  0x46   :  { %1051 = vmatprep.subr.mxu0 %v1300_v5  ;;  %1063 = vmatpush3.msra.mxu1 %v1187_v14 }
  0x47   :  { %1052 = vmatpush3.msra.mxu0 %v1300_v5  ;;  %1064 = vmatprep.subr.mxu1 %v1189_v15 }
  0x48   :  { %1054 = vmatmul.mubr.f32.vlgmr.msra.gmra.mxu0 %v1308_v11  ;;  %1065 = vmatpush3.msra.mxu1 %v1189_v15 }
  0x49   :  { %1072 = vmatprep.mubr.f32.mxu1 %v1291_v63  ;;  %1066 = vmatprep.subr.mxu1 %v1191_v16 }
  0x4a   :  { %1067 = vmatpush3.msra.mxu1 %v1191_v16 }
  0x4b   :  { %1068 = vmatprep.subr.mxu1 %v1203_v22 }
  0x4c   :  { %1069 = vmatpush3.msra.mxu1 %v1203_v22 }
  0x4d   :  { %1070 = vmatprep.subr.mxu1 %v1215_v26 }
  0x4e   :  { %1071 = vmatpush3.msra.mxu1 %v1215_v26 }
  0x4f   :  { %1073 = vmatmul.mubr.f32.vlgmr.msra.gmra.mxu1 %v1308_v11 }
  0xe8   :  { %v979_v8 = vpop.f32.mrf.mxu0 }
  0xe9   :  { %v998_v10 = vpop.f32.mrf.mxu1 }
  0xea   :  { %v174_v9 = vpop.f32.mrf.mxu0  ;;  %v302_v23 = vadd.f32 %v998_v10, %v979_v8 }
  0xeb   :  { %v295_v15 = vpop.f32.mrf.mxu1 }
  0xec   :  { %v296_v16 = vadd.f32 %v295_v15, %v174_v9  ;;  %v785_v15 = vand.u32 127, %v61_v2 }
  0xf8   :  { %v1017_v14 = vpop.f32.mrf.mxu0 }
  0xf9   :  { %v397_v31 = vadd.f32 %v1017_v14, %v302_v23  ;;  %v788_v23 = vsub.s32 %v785_v15, %v1179_v4 }
  0xfa   :  { %v389_v20 = vpop.f32.mrf.mxu0 }
  0xfb   :  { %v390_v33 = vadd.f32 %v389_v20, %v296_v16 }
  0xfd   :  { %v1036_v21 = vpop.f32.mrf.mxu1 }
  0xfe   :  { %v486_v22 = vadd.f32 %v1036_v21, %v397_v31 }
  0xff   :  { %v477_v32 = vpop.f32.mrf.mxu1 }
 0x100   :  { %v478_v37 = vadd.f32 %v477_v32, %v390_v33 }
 0x108   :  { %v1055_v27 = vpop.f32.mrf.mxu0 }
 0x109   :  { %v587_v40 = vadd.f32 %v1055_v27, %v486_v22 }
 0x10a   :  { %v580_v34 = vpop.f32.mrf.mxu0 }
 0x10b   :  { %v581_v41 = vadd.f32 %v580_v34, %v478_v37 }
 0x10f   :  { %v1074_v26 = vpop.f32.mrf.mxu1 }
 0x110   :  { %v672_v42 = vadd.f32 %v1074_v26, %v587_v40 }
 0x111   :  { %v665_v43 = vpop.f32.mrf.mxu1 }
 0x112   :  { %v694_v44 = vcombine.high %v672_v42, %v672_v42  ;;  %v701_v45 = vrot.slane %v672_v42, %v1194_v19  ;;  %v666_v46 = vadd.f32 %v665_v43, %v581_v41 }
 0x114   :  { %v709_v47 = vcombine.high %v701_v45, %v701_v45  ;;  %v677_v48 = vcombine.high %v666_v46, %v666_v46  ;;  %v708_v49 = vrot.slane %v694_v44, %v1194_v19  ;;  %v684_v51 = vrot.slane %v666_v46, %v1194_v19 }
 0x115   :  { %v724_v60 = vadd.f32 %v719_v50, %v701_v45 }
 0x116   :  { %v725_v52 = vadd.f32 %v719_v50, %v709_v47  ;;  %v691_v53 = vrot.slane %v677_v48, %v1194_v19  ;;  %v692_v54 = vcombine.high %v684_v51, %v684_v51  ;;  %v720_v55 = vadd.f32 %v719_v50, %v684_v51  ;;  %v900_v19 = vld [vmem:[%s1429_s3] ss:$0 sm:$0xff]  ;;  %s1149_s3 = smov [#allocation6]  }
 0x117   :  { %v710_v56 = vcombine.high %v708_v49, %v708_v49  ;;  %v726_v63 = vadd.f32 %v719_v50, %v708_v49  ;;  %s891_s13 = sshll.u32 %s1149_s3, 4  ;;  %s892_s13 = int_to_ptr.vmem [resolvable:$true] %s891_s13 }
 0x118   :  { %1081 = vtanh.f32 %v725_v52  ;;  %v693_v57 = vcombine.high %v691_v53, %v691_v53  ;;  %v721_v58 = vadd.f32 %v719_v50, %v692_v54  ;;  %v722_v59 = vadd.f32 %v719_v50, %v691_v53  ;;  %s1121_s14 = scalar_lea.vmem %s892_s13, 32  ;;  %p1126_p6 = scmp.lt.s32.totalorder %s892_s13, %s892_s13 }
 0x119   :  { %1083 = vtanh.f32 %v720_v55  ;;  %v727_v62 = vadd.f32 %v719_v50, %v710_v56  ;;  %p1122_p5 = scmp.ne.s32.totalorder %s892_s13, %s1121_s14  ;;  %p1127_p7 = scmp.lt.s32.totalorder %s1121_s14, %s1121_s14 }
 0x11a   :  { %v723_v61 = vadd.f32 %v719_v50, %v693_v57  ;;  %1085 = vtanh.f32 %v721_v58 }
 0x11b   :  { %1087 = vtanh.f32 %v722_v59  ;;  %p1128_p8 = por %p1127_p7, %p1126_p6 }
 0x11c   :  { %1089 = vtanh.f32 %v723_v61 }
 0x11d   :  { %1091 = vtanh.f32 %v724_v60  ;;  %p1129_p9 = pnand %p1128_p8, %p1122_p5 }
 0x11e   :  { %1093 = vtanh.f32 %v727_v62 }
 0x11f   :  { %1095 = vtanh.f32 %v726_v63 }
 0x125   :  { %v1082_v0 = vpop.eup %1081 }
 0x126   :  { %v748_v1 = vmul.f32 %v1082_v0, %v900_v19  ;;  %v1084_v3 = vpop.eup %1083 }
 0x127   :  { %v1086_v6 = vpop.eup %1085  ;;  %v743_v7 = vmul.f32 %v1084_v3, %v900_v19 }
 0x128   :  { %v767_v5 = vsel %vm751_vm1, %v748_v1, 0.0  ;;  %v1088_v11 = vpop.eup %1087  ;;  %v744_v17 = vmul.f32 %v1086_v6, %v900_v19 }
 0x129   :  { %768 = vadd.xlane.f32.xlu1 %v767_v5  ;;  %v1090_v12 = vpop.eup %1089  ;;  %v752_v13 = vsel %vm751_vm1, %v743_v7, 0.0  ;;  %v745_v18 = vmul.f32 %v1088_v11, %v900_v19 }
 0x12a   :  { %v1092_v24 = vpop.eup %1091  ;;  %753 = vadd.xlane.f32.xlu0 %v752_v13  ;;  %v746_v28 = vmul.f32 %v1090_v12, %v900_v19  ;;  %v755_v30 = vsel %vm751_vm1, %v744_v17, 0.0 }
 0x12b   :  { %v758_v25 = vsel %vm751_vm1, %v745_v18, 0.0  ;;  %v1094_v29 = vpop.eup %1093  ;;  %v747_v35 = vmul.f32 %v1092_v24, %v900_v19 }
 0x12c   :  { %v1096_v36 = vpop.eup %1095  ;;  %v761_v38 = vsel %vm751_vm1, %v746_v28, 0.0  ;;  %v750_v39 = vmul.f32 %v1094_v29, %v900_v19 }
 0x12d   :  { %759 = vadd.xlane.f32.xlu1 %v758_v25  ;;  %v764_v8 = vsel %vm751_vm1, %v747_v35, 0.0  ;;  %v749_v9 = vmul.f32 %v1096_v36, %v900_v19 }
 0x12e   :  { %756 = vadd.xlane.f32.xlu0 %v755_v30  ;;  %v773_v10 = vsel %vm751_vm1, %v750_v39, 0.0 }
 0x12f   :  { %v770_v14 = vsel %vm751_vm1, %v749_v9, 0.0 }
 0x131   :  { %762 = vadd.xlane.f32.xlu1 %v761_v38 }
 0x132   :  { %765 = vadd.xlane.f32.xlu0 %v764_v8 }
 0x135   :  { %774 = vadd.xlane.f32.xlu1 %v773_v10 }
 0x136   :  { %771 = vadd.xlane.f32.xlu0 %v770_v14 }
 0x1b2   :  { %v769_v20 = vpop.xlane.xlu1 %768 }
 0x1b3   :  { %v754_v21 = vpop.xlane.xlu0 %753  ;;  %v809_v42 = vrot.slane %v769_v20, %v788_v23 }
 0x1b4   :  { %v789_v32 = vrot.slane %v754_v21, %v788_v23 }
 0x1b6   :  { %v760_v27 = vpop.xlane.xlu1 %759 }
 0x1b7   :  { %v757_v16 = vpop.xlane.xlu0 %756  ;;  %v797_v31 = vrot.slane %v760_v27, %v788_v23 }
 0x1b8   :  { %v793_v33 = vrot.slane %v757_v16, %v788_v23 }
 0x1ba   :  { %v763_v22 = vpop.xlane.xlu1 %762  ;;  %v819_v34 = vsel %vm818_vm2, %v793_v33, %v789_v32 }
 0x1bb   :  { %v801_v37 = vrot.slane %v763_v22, %v788_v23  ;;  %v821_v40 = vsel %vm820_vm3, %v797_v31, %v819_v34  ;;  %v766_v26 = vpop.xlane.xlu0 %765 }
 0x1bc   :  { %v805_v41 = vrot.slane %v766_v26, %v788_v23 }
 0x1bd   :  { %v823_v2 = vsel %vm822_vm4, %v801_v37, %v821_v40 }
 0x1be   :  { %v775_v43 = vpop.xlane.xlu1 %774  ;;  %v825_v4 = vsel %vm824_vm5, %v805_v41, %v823_v2 }
 0x1bf   :  { %v772_v44 = vpop.xlane.xlu0 %771  ;;  %v827_v45 = vsel %vm826_vm6, %v809_v42, %v825_v4  ;;  %v817_v46 = vrot.slane %v775_v43, %v788_v23 }
 0x1c0   :  { %v813_v47 = vrot.slane %v772_v44, %v788_v23 }
 0x1c2   :  { %v829_v48 = vsel %vm828_vm7, %v813_v47, %v827_v45 }
 0x1c3   :  { %v831_v49 = vsel %vm830_vm8, %v817_v46, %v829_v48 }
 0x1c4   :  { %834 = vst.msk [vmem:[#allocation2] sm:$0xff] %vm833_vm9, %v831_v49 }
 0x1cb   :  { %v839_v50 = vld [vmem:[#allocation2] sm:$0xff] }
 0x1cc   :  { %840 = vxpose.xlu0.b32.start.end [1/1] (short) (narrow) %v839_v50, 8 }
 0x248   :  { %v856_v51 = vpop.trf.xlu0 }
 0x249   :  { %v873_v52 = vsel %vm872_vm10, %v856_v51, -inf }
 0x24a   :  { %874 = vmax.xlane.f32.xlu1 %v873_v52 }
 0x2d3   :  { %v875_v53 = vpop.xlane.xlu1 %874 }
 0x2d4   :  { %v876_v54 = vsub.f32 %v856_v51, %v875_v53 }
 0x2d6   :  { %v877_v55 = vmul.f32 1.442695, %v876_v54 }
 0x2d8   :  { %1097 = vpow2.f32 %v877_v55 }
 0x2e5   :  { %v1098_v56 = vpop.eup %1097 }
 0x2e6   :  { %v879_v57 = vsel %vm872_vm10, %v1098_v56, 0.0 }
 0x2e7   :  { %880 = vadd.xlane.f32.xlu1 %v879_v57 }
 0x370   :  { %v881_v58 = vpop.xlane.xlu1 %880 }
 0x371   :  { %1099 = vrcp.f32 %v881_v58 }
 0x37e   :  { %v1100_v59 = vpop.eup %1099 }
 0x37f   :  { %v883_v60 = vmul.f32 %v1100_v59, %v1098_v56 }
 0x381   :  { %884 = vst.msk [vmem:[#allocation6] sm:$0x3] %vm872_vm10, %v883_v60 }
 0x382   :  { %1132 = shalt.err (!%p1129_p9)
}
 0x383   :  { %894 = dma.vmem_to_hbm [thread:$0]  %s892_s13, 32, %s1430_s4, [#allocation5]  }
 0x384   :  { %1143 = dma.done.wait [#allocation5], 32  }
 0x385   :  { %1144 = vsyncadd [#allocation5], 4294967264 }
 0x386   :  { %898 = vsyncpa [#allocation4], 1 }
 0x387   :  { %899 = vsyncpa [#allocation5], 1 }

</bundles_post_ra>
